<compile_context>
chip_gen: v7x
topology: tpu7x:2x2x1
jax: 0.10.0
libtpu: 0.0.40
codegen_flags: <defaults>
</compile_context>

<pallas_src>
import jax
import jax.numpy as jnp
from jax.experimental import pallas as pl
from jax.experimental.pallas import tpu as pltpu


# ----------------------------------------------------------------------------
# Tuning constants
# ----------------------------------------------------------------------------
MIN_SLAB_BYTES = 16 << 10   # per-channel slab (N*H*W*itemsize) gate for DMA path
MIN_ROW_BYTES = 512         # contiguous row (H*W*itemsize) gate for DMA path
# Bytes to keep in flight on the HBM->HBM gather path.  Sized for v7x
# (~3.2 TB/s x ~2 us DMA start latency); on v6e/v5e the same depth simply
# over-covers latency, which is harmless because semaphores use no VMEM.
TARGET_INFLIGHT_BYTES = 6 << 20


def _pick_ring_depth(per_copy_bytes: int, n_copies: int) -> int:
    """DMA ring depth: cover TARGET_INFLIGHT_BYTES, power of two in [4, 32]."""
    d = -(-TARGET_INFLIGHT_BYTES // max(per_copy_bytes, 1))  # ceil divide
    d = max(4, min(32, d))
    d = 1 << (d - 1).bit_length()        # power of two => `k % D` lowers to AND
    return max(1, min(d, n_copies, 32))


def _rle_runs(idx_list, C):
    """Run-length-encode ascending-consecutive indices into copy runs.

    Returns a list of (src_start, dst_start, run_len); dst positions are the
    output channel slots (always consecutive by construction).
    """
    runs = []
    for dst, src in enumerate(idx_list):
        if runs and runs[-1][0] + runs[-1][2] == src:
            s, d, ln = runs[-1]
            runs[-1] = (s, d, ln + 1)
        else:
            runs.append((src, dst, 1))
    return runs


# ----------------------------------------------------------------------------
# Static-runs kernel (primary path): runs baked in as Python constants.
# ----------------------------------------------------------------------------
def _make_static_runs_kernel(runs, D: int, num_cores: int):
    """Gather statically-known channel runs with direct HBM->HBM DMAs.

    Runs are balanced across `num_cores` TensorCores (leading grid axis); each
    core drives its own ring of D DMA semaphores.  All slice bounds are Python
    constants, so every wait descriptor exactly matches the byte count of the
    copy that last used its semaphore slot (required for variable run_len).

    Kernel args: x_hbm [N, C, HW], o_hbm [N, K, HW] (both pl.ANY), sems [num_cores*D].
    """
    # Greedy byte-balanced assignment of runs to cores.
    per_core = [[] for _ in range(num_cores)]
    load = [0] * num_cores
    for (src, dst, ln) in runs:
        c = load.index(min(load))
        per_core[c].append((src, dst, ln))
        load[c] += ln

    def kernel(x_hbm, o_hbm, sems):
        core = pl.program_id(0)
        for c in range(num_cores):
            core_runs = per_core[c]
            if not core_runs:
                continue
            Dc = min(D, len(core_runs))

            @pl.when(core == c)
            def _issue(c=c, core_runs=core_runs, Dc=Dc):
                n = len(core_runs)
                for i, (src, dst, ln) in enumerate(core_runs):
                    slot = c * D + (i % Dc)
                    if i >= Dc:
                        # Retire the copy that previously used this slot; the
                        # wait descriptor mirrors that copy's exact shape.
                        psrc, pdst, pln = core_runs[i - Dc]
                        pltpu.make_async_copy(
                            x_hbm.at[:, pl.ds(psrc, pln)],
                            o_hbm.at[:, pl.ds(pdst, pln)],
                            sems.at[slot],
                        ).wait()
                    pltpu.make_async_copy(
                        x_hbm.at[:, pl.ds(src, ln)],   # selected channel run
                        o_hbm.at[:, pl.ds(dst, ln)],   # its output slot(s)
                        sems.at[slot],
                    ).start()
                # Drain: the last min(Dc, n) copies are still in flight.
                for i in range(n - Dc, n):
                    src, dst, ln = core_runs[i]
                    slot = c * D + (i % Dc)
                    pltpu.make_async_copy(
                        x_hbm.at[:, pl.ds(src, ln)],
                        o_hbm.at[:, pl.ds(dst, ln)],
                        sems.at[slot],
                    ).wait()

    return kernel


def _static_gather(x3, runs, K: int, slab_bytes: int):
    N, C, HW = x3.shape
    n_runs = len(runs)
    D = _pick_ring_depth(slab_bytes, n_runs)
    num_cores = 2 if n_runs >= 2 else 1   # split descriptor issue across TCs

    return pl.pallas_call(
        _make_static_runs_kernel(runs, D, num_cores),
        grid_spec=pltpu.PrefetchScalarGridSpec(
            num_scalar_prefetch=0,
            grid=(num_cores,),
            in_specs=[pl.BlockSpec(memory_space=pl.ANY)],   # raw HBM input
            out_specs=pl.BlockSpec(memory_space=pl.ANY),    # raw HBM output
            scratch_shapes=[pltpu.SemaphoreType.DMA((num_cores * D,))],
        ),
        out_shape=jax.ShapeDtypeStruct((N, K, HW), x3.dtype),
        compiler_params=pltpu.CompilerParams(
            dimension_semantics=("parallel",),
            has_side_effects=True,   # output is written via manual DMA only
        ),
    )(x3)


# ----------------------------------------------------------------------------
# Dynamic scalar-prefetch kernel (fallback for huge uncoalescable index lists).
# ----------------------------------------------------------------------------
def _make_dynamic_gather_kernel(K: int, D: int):
    """Gather K channels, indices read from SMEM, uniform [N,1,HW] copies."""

    def kernel(idx_ref, x_hbm, o_hbm, sems):
        @pl.loop(0, K)
        def _issue(k):
            # Read the index *before* the semaphore wait: `.wait()` breaks
            # SMEM sst->sld forwarding, so hoisting keeps the source address
            # ready the moment the semaphore clears.
            c = idx_ref[k]
            slot = k % D

            @pl.when(k >= D)
            def _():
                # Every copy moves the same [N, 1, HW] byte count, so a dummy
                # descriptor of that shape is a valid wait for this slot.
                pltpu.make_async_copy(
                    x_hbm.at[:, pl.ds(0, 1)],
                    o_hbm.at[:, pl.ds(0, 1)],
                    sems.at[slot],
                ).wait()

            pltpu.make_async_copy(
                x_hbm.at[:, pl.ds(c, 1)],
                o_hbm.at[:, pl.ds(k, 1)],
                sems.at[slot],
            ).start()

        @pl.loop(0, min(D, K))
        def _drain(i):
            pltpu.make_async_copy(
                x_hbm.at[:, pl.ds(0, 1)],
                o_hbm.at[:, pl.ds(0, 1)],
                sems.at[i],
            ).wait()

    return kernel


def _dynamic_gather(x3, idx_list, K: int, slab_bytes: int):
    N, C, HW = x3.shape
    D = _pick_ring_depth(slab_bytes, K)
    indices = jnp.asarray(idx_list, dtype=jnp.int32)   # already clamped host-side

    return pl.pallas_call(
        _make_dynamic_gather_kernel(K, D),
        grid_spec=pltpu.PrefetchScalarGridSpec(
            num_scalar_prefetch=1,
            grid=(1,),
            in_specs=[pl.BlockSpec(memory_space=pl.ANY)],
            out_specs=pl.BlockSpec(memory_space=pl.ANY),
            scratch_shapes=[pltpu.SemaphoreType.DMA((D,))],
        ),
        out_shape=jax.ShapeDtypeStruct((N, K, HW), x3.dtype),
        compiler_params=pltpu.CompilerParams(
            dimension_semantics=("arbitrary",),
            has_side_effects=True,
        ),
    )(indices, x3)


# ----------------------------------------------------------------------------
# Wrapper
# ----------------------------------------------------------------------------
def index_select_dim1(
    x: jax.Array,
    indices,
    *,
    force_pallas: bool = False,
    max_static_runs: int = 128,
) -> jax.Array:
    """Pallas equivalent of torch.index_select(x, dim=1, index=indices).

    x:       [N, C, H, W]
    indices: host-known sequence of integer channel indices (the module's
             registered buffer).  Out-of-range values are clamped to [0, C-1]
             host-side (torch would raise — documented divergence).
    returns: [N, K, H, W]
    """
    N, C, H, W = x.shape
    # Host-side clamp once (no per-call XLA op; indices are static Python ints).
    idx_list = [min(max(int(i), 0), C - 1) for i in indices]
    K = len(idx_list)
    if K == 0:
        return jnp.zeros((N, 0, H, W), dtype=x.dtype)

    HW = H * W
    itemsize = x.dtype.itemsize
    slab_bytes = N * HW * itemsize   # bytes moved per selected channel
    row_bytes = HW * itemsize        # contiguous chunk within a slab

    # Geometry gate: a strided HBM->HBM DMA with short contiguous rows or tiny
    # slabs runs far below roofline; XLA's fused gather wins there.
    if not force_pallas and (slab_bytes < MIN_SLAB_BYTES or row_bytes < MIN_ROW_BYTES):
        return jnp.take(x, jnp.asarray(idx_list, dtype=jnp.int32), axis=1)

    # Flatten spatial dims: each channel slab is N contiguous runs of H*W
    # elements — a DMA-friendly strided copy.  Reshape is a free view.
    x3 = x.reshape(N, C, HW)

    runs = _rle_runs(idx_list, C)
    if len(runs) <= max_static_runs:
        out3 = _static_gather(x3, runs, K, slab_bytes)
    else:
        # Pathologically large, uncoalescable index list: avoid unrolling
        # thousands of static copies; use the scalar-prefetch kernel instead.
        out3 = _dynamic_gather(x3, idx_list, K, slab_bytes)

    return out3.reshape(N, K, H, W)


class IndexPallas:
    """Mirror of moai.monads.masking.mask.Index (dim=1 only)."""

    def __init__(self, indices, dim: int = 1, persistent: bool = True,
                 force_pallas: bool = False):
        # TODO(synk): only the default dim=1 (channel) case is implemented.
        assert dim == 1, "This Pallas kernel implements the default dim=1 case."
        del persistent  # buffer persistence is a torch-serialization concern
        if isinstance(indices, int):
            indices = [indices]
        self.indices = tuple(int(i) for i in indices)
        self._force_pallas = force_pallas

    def __call__(self, tensor: jax.Array) -> jax.Array:
        return index_select_dim1(
            tensor, self.indices, force_pallas=self._force_pallas
        )


if __name__ == "__main__":
    key = jax.random.PRNGKey(0)
    N, C, H, W = 2, 4, 16, 16
    x = jax.random.normal(key, (N, C, H, W), dtype=jnp.float32)

    # Force the Pallas path so the kernels are compiled and run even at this
    # tiny demo size (production sizes take the DMA path automatically).

    # 1) Permuted, non-contiguous selection -> static-runs kernel, 2-core grid.
    idx1 = [2, 0, 3]
    out1 = IndexPallas(idx1, dim=1, force_pallas=True)(x)
    jax.block_until_ready(out1)
    ref1 = jnp.take(x, jnp.asarray(idx1, dtype=jnp.int32), axis=1)
    assert out1.shape == (N, len(idx1), H, W)
    assert out1.dtype == x.dtype
    assert jnp.array_equal(out1, ref1)

    # 2) Contiguous selection -> RLE coalesces the gather to a single DMA.
    idx2 = [1, 2, 3]
    out2 = IndexPallas(idx2, dim=1, force_pallas=True)(x)
    jax.block_until_ready(out2)
    ref2 = jnp.take(x, jnp.asarray(idx2, dtype=jnp.int32), axis=1)
    assert jnp.array_equal(out2, ref2)

    # 3) Dynamic scalar-prefetch fallback (forced via max_static_runs=0).
    idx3 = [3, 1, 0, 2]
    out3 = index_select_dim1(x, idx3, force_pallas=True, max_static_runs=0)
    jax.block_until_ready(out3)
    ref3 = jnp.take(x, jnp.asarray(idx3, dtype=jnp.int32), axis=1)
    assert jnp.array_equal(out3, ref3)

    print("KERNEL_OK")
</pallas_src>

<mosaic_0001>
module attributes {stable_mosaic.version = 11 : i64} {
  func.func @kernel(%arg0: i32, %arg1: memref<2x4x256xf32, #tpu.memory_space<any>>, %arg2: memref<2x3x256xf32, #tpu.memory_space<any>>, %arg3: memref<6x!tpu.dma_semaphore, #tpu.memory_space<semaphore_mem>>) attributes {dimension_semantics = [#tpu.dimension_semantics<parallel>], iteration_bounds = array<i64: 2>, scalar_prefetch = 0 : i64, scratch_operands = 1 : i64, tpu.core_type = #tpu.core_type<tc>, window_params = [{}, {}]} {
    %c0_i32 = arith.constant 0 : i32
    %0 = arith.cmpi eq, %arg0, %c0_i32 : i32
    %1 = arith.extui %0 : i1 to i32
    %c0_i32_0 = arith.constant 0 : i32
    %2 = arith.cmpi ne, %1, %c0_i32_0 : i32
    scf.if %2 {
      %c0_i32_2 = arith.constant 0 : i32
      %c0_i32_3 = arith.constant 0 : i32
      %c2_i32 = arith.constant 2 : i32
      %c0_i32_4 = arith.constant 0 : i32
      %6 = tpu.memref_slice %arg1[%c0_i32_3, %c2_i32, %c0_i32_4] : memref<2x4x256xf32, #tpu.memory_space<any>> -> memref<2x1x256xf32, #tpu.memory_space<any>>
      %c0_i32_5 = arith.constant 0 : i32
      %c0_i32_6 = arith.constant 0 : i32
      %c0_i32_7 = arith.constant 0 : i32
      %7 = tpu.memref_slice %arg2[%c0_i32_5, %c0_i32_6, %c0_i32_7] : memref<2x3x256xf32, #tpu.memory_space<any>> -> memref<2x1x256xf32, #tpu.memory_space<any>>
      %8 = tpu.memref_slice %arg3[%c0_i32_2] : memref<6x!tpu.dma_semaphore, #tpu.memory_space<semaphore_mem>> -> memref<1x!tpu.dma_semaphore, #tpu.memory_space<semaphore_mem>>
      %9 = tpu.memref_squeeze %8 : memref<1x!tpu.dma_semaphore, #tpu.memory_space<semaphore_mem>> -> memref<!tpu.dma_semaphore, #tpu.memory_space<semaphore_mem>>
      tpu.enqueue_dma source(%6 : memref<2x1x256xf32, #tpu.memory_space<any>>) target(%7 : memref<2x1x256xf32, #tpu.memory_space<any>>) target_semaphore(%9 : memref<!tpu.dma_semaphore, #tpu.memory_space<semaphore_mem>>)
      %c1_i32_8 = arith.constant 1 : i32
      %c0_i32_9 = arith.constant 0 : i32
      %c3_i32 = arith.constant 3 : i32
      %c0_i32_10 = arith.constant 0 : i32
      %10 = tpu.memref_slice %arg1[%c0_i32_9, %c3_i32, %c0_i32_10] : memref<2x4x256xf32, #tpu.memory_space<any>> -> memref<2x1x256xf32, #tpu.memory_space<any>>
      %c0_i32_11 = arith.constant 0 : i32
      %c2_i32_12 = arith.constant 2 : i32
      %c0_i32_13 = arith.constant 0 : i32
      %11 = tpu.memref_slice %arg2[%c0_i32_11, %c2_i32_12, %c0_i32_13] : memref<2x3x256xf32, #tpu.memory_space<any>> -> memref<2x1x256xf32, #tpu.memory_space<any>>
      %12 = tpu.memref_slice %arg3[%c1_i32_8] : memref<6x!tpu.dma_semaphore, #tpu.memory_space<semaphore_mem>> -> memref<1x!tpu.dma_semaphore, #tpu.memory_space<semaphore_mem>>
      %13 = tpu.memref_squeeze %12 : memref<1x!tpu.dma_semaphore, #tpu.memory_space<semaphore_mem>> -> memref<!tpu.dma_semaphore, #tpu.memory_space<semaphore_mem>>
      tpu.enqueue_dma source(%10 : memref<2x1x256xf32, #tpu.memory_space<any>>) target(%11 : memref<2x1x256xf32, #tpu.memory_space<any>>) target_semaphore(%13 : memref<!tpu.dma_semaphore, #tpu.memory_space<semaphore_mem>>)
      %c0_i32_14 = arith.constant 0 : i32
      %c0_i32_15 = arith.constant 0 : i32
      %c2_i32_16 = arith.constant 2 : i32
      %c0_i32_17 = arith.constant 0 : i32
      %14 = tpu.memref_slice %arg1[%c0_i32_15, %c2_i32_16, %c0_i32_17] : memref<2x4x256xf32, #tpu.memory_space<any>> -> memref<2x1x256xf32, #tpu.memory_space<any>>
      %c0_i32_18 = arith.constant 0 : i32
      %c0_i32_19 = arith.constant 0 : i32
      %c0_i32_20 = arith.constant 0 : i32
      %15 = tpu.memref_slice %arg2[%c0_i32_18, %c0_i32_19, %c0_i32_20] : memref<2x3x256xf32, #tpu.memory_space<any>> -> memref<2x1x256xf32, #tpu.memory_space<any>>
      %16 = tpu.memref_slice %arg3[%c0_i32_14] : memref<6x!tpu.dma_semaphore, #tpu.memory_space<semaphore_mem>> -> memref<1x!tpu.dma_semaphore, #tpu.memory_space<semaphore_mem>>
      %17 = tpu.memref_squeeze %16 : memref<1x!tpu.dma_semaphore, #tpu.memory_space<semaphore_mem>> -> memref<!tpu.dma_semaphore, #tpu.memory_space<semaphore_mem>>
      tpu.wait_dma2 semaphore(%17 : memref<!tpu.dma_semaphore, #tpu.memory_space<semaphore_mem>>) src(%14 : memref<2x1x256xf32, #tpu.memory_space<any>>) dst(%15 : memref<2x1x256xf32, #tpu.memory_space<any>>)
      %c1_i32_21 = arith.constant 1 : i32
      %c0_i32_22 = arith.constant 0 : i32
      %c3_i32_23 = arith.constant 3 : i32
      %c0_i32_24 = arith.constant 0 : i32
      %18 = tpu.memref_slice %arg1[%c0_i32_22, %c3_i32_23, %c0_i32_24] : memref<2x4x256xf32, #tpu.memory_space<any>> -> memref<2x1x256xf32, #tpu.memory_space<any>>
      %c0_i32_25 = arith.constant 0 : i32
      %c2_i32_26 = arith.constant 2 : i32
      %c0_i32_27 = arith.constant 0 : i32
      %19 = tpu.memref_slice %arg2[%c0_i32_25, %c2_i32_26, %c0_i32_27] : memref<2x3x256xf32, #tpu.memory_space<any>> -> memref<2x1x256xf32, #tpu.memory_space<any>>
      %20 = tpu.memref_slice %arg3[%c1_i32_21] : memref<6x!tpu.dma_semaphore, #tpu.memory_space<semaphore_mem>> -> memref<1x!tpu.dma_semaphore, #tpu.memory_space<semaphore_mem>>
      %21 = tpu.memref_squeeze %20 : memref<1x!tpu.dma_semaphore, #tpu.memory_space<semaphore_mem>> -> memref<!tpu.dma_semaphore, #tpu.memory_space<semaphore_mem>>
      tpu.wait_dma2 semaphore(%21 : memref<!tpu.dma_semaphore, #tpu.memory_space<semaphore_mem>>) src(%18 : memref<2x1x256xf32, #tpu.memory_space<any>>) dst(%19 : memref<2x1x256xf32, #tpu.memory_space<any>>)
    } else {
    }
    %c1_i32 = arith.constant 1 : i32
    %3 = arith.cmpi eq, %arg0, %c1_i32 : i32
    %4 = arith.extui %3 : i1 to i32
    %c0_i32_1 = arith.constant 0 : i32
    %5 = arith.cmpi ne, %4, %c0_i32_1 : i32
    scf.if %5 {
      %c3_i32 = arith.constant 3 : i32
      %c0_i32_2 = arith.constant 0 : i32
      %c0_i32_3 = arith.constant 0 : i32
      %c0_i32_4 = arith.constant 0 : i32
      %6 = tpu.memref_slice %arg1[%c0_i32_2, %c0_i32_3, %c0_i32_4] : memref<2x4x256xf32, #tpu.memory_space<any>> -> memref<2x1x256xf32, #tpu.memory_space<any>>
      %c0_i32_5 = arith.constant 0 : i32
      %c1_i32_6 = arith.constant 1 : i32
      %c0_i32_7 = arith.constant 0 : i32
      %7 = tpu.memref_slice %arg2[%c0_i32_5, %c1_i32_6, %c0_i32_7] : memref<2x3x256xf32, #tpu.memory_space<any>> -> memref<2x1x256xf32, #tpu.memory_space<any>>
      %8 = tpu.memref_slice %arg3[%c3_i32] : memref<6x!tpu.dma_semaphore, #tpu.memory_space<semaphore_mem>> -> memref<1x!tpu.dma_semaphore, #tpu.memory_space<semaphore_mem>>
      %9 = tpu.memref_squeeze %8 : memref<1x!tpu.dma_semaphore, #tpu.memory_space<semaphore_mem>> -> memref<!tpu.dma_semaphore, #tpu.memory_space<semaphore_mem>>
      tpu.enqueue_dma source(%6 : memref<2x1x256xf32, #tpu.memory_space<any>>) target(%7 : memref<2x1x256xf32, #tpu.memory_space<any>>) target_semaphore(%9 : memref<!tpu.dma_semaphore, #tpu.memory_space<semaphore_mem>>)
      %c3_i32_8 = arith.constant 3 : i32
      %c0_i32_9 = arith.constant 0 : i32
      %c0_i32_10 = arith.constant 0 : i32
      %c0_i32_11 = arith.constant 0 : i32
      %10 = tpu.memref_slice %arg1[%c0_i32_9, %c0_i32_10, %c0_i32_11] : memref<2x4x256xf32, #tpu.memory_space<any>> -> memref<2x1x256xf32, #tpu.memory_space<any>>
      %c0_i32_12 = arith.constant 0 : i32
      %c1_i32_13 = arith.constant 1 : i32
      %c0_i32_14 = arith.constant 0 : i32
      %11 = tpu.memref_slice %arg2[%c0_i32_12, %c1_i32_13, %c0_i32_14] : memref<2x3x256xf32, #tpu.memory_space<any>> -> memref<2x1x256xf32, #tpu.memory_space<any>>
      %12 = tpu.memref_slice %arg3[%c3_i32_8] : memref<6x!tpu.dma_semaphore, #tpu.memory_space<semaphore_mem>> -> memref<1x!tpu.dma_semaphore, #tpu.memory_space<semaphore_mem>>
      %13 = tpu.memref_squeeze %12 : memref<1x!tpu.dma_semaphore, #tpu.memory_space<semaphore_mem>> -> memref<!tpu.dma_semaphore, #tpu.memory_space<semaphore_mem>>
      tpu.wait_dma2 semaphore(%13 : memref<!tpu.dma_semaphore, #tpu.memory_space<semaphore_mem>>) src(%10 : memref<2x1x256xf32, #tpu.memory_space<any>>) dst(%11 : memref<2x1x256xf32, #tpu.memory_space<any>>)
    } else {
    }
    return
  }
}

</mosaic_0001>

<bundles_post_ra>
// kernel: tpu_custom_call.1
= control target key start
LH: loop header
LB: loop body
LE: loop exit
PB: predicated region body
PF: predicated region fallthrough
CT: control target
= control target key end

     0   :  { %s242_s6 = smov 0   ;;  %s359_s0 = inlined_call_operand.hbm [shape: f32[2,4,256], index: 0, kind: input, shape index: {}]   ;;  %s360_s1 = inlined_call_operand.vmem [shape: f32[2,3,256], index: 1, kind: output, shape index: {}]  }
   0x1 LB: > { %s250_s9 = scalar_lea.hbm %s359_s0, 32  ;;  %s19_s12 = sshll.u32 %s360_s1, 4  ;;  %s228_s6 = sphi %s242_s6, %s11_s6   ;;  %s256_s12 = int_to_ptr.vmem [resolvable:$true] %s19_s12 }
   0x2   : > { %p114_p0 = scmp.eq.s32.totalorder %s228_s6, 0  ;;  %s154_s15 = scalar_lea.hbm %s359_s0, 96 }
   0x3   : > { %p127_p1 = scmp.ne.s32.totalorder %s250_s9, %s154_s15  ;;  %s267_s18 = scalar_lea.hbm %s359_s0, 256 }
   0x4   : > { %p131_p4 = scmp.lt.u32.totalorder %s250_s9, %s359_s0  ;;  %p132_p5 = scmp.lt.u32.totalorder %s267_s18, %s154_s15 }
   0x5   : > { %p128_p2 = pnand %p127_p1, %p114_p0  ;;  %p134_p7 = scmp.lt.u32.totalorder %s154_s15, %s250_s9 }
   0x6   : > { %p133_p6 = por %p132_p5, %p131_p4 }
   0x7   : > { %p129_p3 = pneg %p128_p2 }
   0x8   : > { %p135_p8 = por %p134_p7, %p133_p6 }
   0xa   : > { %p136_p9 = pnand %p135_p8, %p129_p3 }
   0xc   : > { %139 = shalt.err (!%p136_p9)  }
   0xd   : > { %s140_s21 = scalar_lea.vmem %s256_s12, 64  ;;  %s280_s22 = scalar_lea.vmem %s256_s12, 256 }
   0xe   : > { %p141_p10 = scmp.ne.s32.totalorder %s256_s12, %s140_s21  ;;  %p147_p13 = scmp.lt.s32.totalorder %s256_s12, %s256_s12 }
   0xf   : > { %p148_p1 = scmp.lt.s32.totalorder %s280_s22, %s140_s21 }
  0x10   : > { %p142_p11 = pnand %p141_p10, %p114_p0 }
  0x11   : > { %p149_p2 = por %p148_p1, %p147_p13 }
  0x12   : > { %p143_p12 = pneg %p142_p11 }
  0x14   : > { %p150_p4 = pnand %p149_p2, %p143_p12 }
  0x16   : > { %153 = shalt.err (!%p150_p4)  }
  0x17   : > { %s230_s23 = smov 64   ;;  %s231_s24 = smov 1  }
  0x18   : > { %107 = dma.hbm_to_vmem [thread:$0]  (%p114_p0), %s250_s9, 64, %s256_s12, [#allocation2], %s230_s23, %s230_s23, %s231_s24 }
  0x19   : > { %s23_s27 = scalar_lea.hbm %s359_s0, 48  ;;  %s24_s30 = scalar_lea.vmem %s360_s1, 2 }
  0x1a   : > { %s27_s2 = sshll.u32 %s24_s30, 4  ;;  %s183_s5 = scalar_lea.hbm %s359_s0, 112  ;;  %s28_s2 = int_to_ptr.vmem [resolvable:$true] %s27_s2 }
  0x1b   : > { %p156_p3 = scmp.ne.s32.totalorder %s23_s27, %s183_s5  ;;  %p160_p7 = scmp.lt.u32.totalorder %s23_s27, %s359_s0 }
  0x1c   : > { %p161_p8 = scmp.lt.u32.totalorder %s267_s18, %s183_s5  ;;  %p163_p10 = scmp.lt.u32.totalorder %s183_s5, %s23_s27 }
  0x1d   : > { %p157_p5 = pnand %p156_p3, %p114_p0 }
  0x1e   : > { %p162_p9 = por %p161_p8, %p160_p7 }
  0x1f   : > { %p158_p6 = pneg %p157_p5 }
  0x20   : > { %p164_p11 = por %p163_p10, %p162_p9 }
  0x22   : > { %p165_p12 = pnand %p164_p11, %p158_p6 }
  0x24   : > { %168 = shalt.err (!%p165_p12)  }
  0x25   : > { %s169_s9 = scalar_lea.vmem %s28_s2, 64  ;;  %p176_p4 = scmp.lt.s32.totalorder %s28_s2, %s256_s12 }
  0x26   : > { %p170_p13 = scmp.ne.s32.totalorder %s28_s2, %s169_s9  ;;  %p177_p3 = scmp.lt.s32.totalorder %s280_s22, %s169_s9 }
  0x28   : > { %p171_p1 = pnand %p170_p13, %p114_p0  ;;  %p178_p5 = por %p177_p3, %p176_p4 }
  0x2a   : > { %p172_p2 = pneg %p171_p1 }
  0x2c   : > { %p179_p7 = pnand %p178_p5, %p172_p2 }
  0x2e   : > { %182 = shalt.err (!%p179_p7)  }
  0x2f   : > { %108 = dma.hbm_to_vmem [thread:$0]  (%p114_p0), %s23_s27, 64, %s28_s2, [#allocation2 + $0x1], %s230_s23, %s230_s23, %s231_s24 }
  0x30   : > { %215 = dma.done.wait (%p114_p0), [#allocation2], 64 }
  0x31   : > { %217 = vsyncadd (%p114_p0), [#allocation2], 4294967232 }
  0x32   : > { %219 = dma.done.wait (%p114_p0), [#allocation2 + $0x1], 64 }
  0x33   : > { %221 = vsyncadd (%p114_p0), [#allocation2 + $0x1], 4294967232  ;;  %p115_p6 = scmp.eq.s32.totalorder %s228_s6, 1  ;;  %s41_s13 = scalar_lea.vmem %s360_s1, 1 }
  0x34   : > { %s44_s14 = sshll.u32 %s41_s13, 4  ;;  %s184_s17 = scalar_lea.hbm %s359_s0, 64  ;;  %s45_s14 = int_to_ptr.vmem [resolvable:$true] %s44_s14 }
  0x35   : > { %p185_p8 = scmp.ne.s32.totalorder %s359_s0, %s184_s17  ;;  %p189_p10 = scmp.lt.u32.totalorder %s267_s18, %s184_s17 }
  0x36   : > { %p190_p11 = scmp.lt.u32.totalorder %s184_s17, %s359_s0 }
  0x37   : > { %p186_p0 = pnand %p185_p8, %p115_p6 }
  0x38   : > { %p191_p12 = por %p190_p11, %p189_p10 }
  0x39   : > { %p187_p9 = pneg %p186_p0 }
  0x3b   : > { %p192_p13 = pnand %p191_p12, %p187_p9 }
  0x3d   : > { %195 = shalt.err (!%p192_p13)  }
  0x3e   : > { %s196_s26 = scalar_lea.vmem %s45_s14, 64  ;;  %p203_p3 = scmp.lt.s32.totalorder %s45_s14, %s256_s12 }
  0x3f   : > { %p197_p1 = scmp.ne.s32.totalorder %s45_s14, %s196_s26  ;;  %p204_p5 = scmp.lt.s32.totalorder %s280_s22, %s196_s26 }
  0x41   : > { %p198_p2 = pnand %p197_p1, %p115_p6  ;;  %p205_p7 = por %p204_p5, %p203_p3 }
  0x43   : > { %p199_p4 = pneg %p198_p2 }
  0x45   : > { %p206_p8 = pnand %p205_p7, %p199_p4 }
  0x47   : > { %209 = shalt.err (!%p206_p8)  }
  0x48   : > { %112 = dma.hbm_to_vmem [thread:$0]  (%p115_p6), %s359_s0, 64, %s45_s14, [#allocation2 + $0x3], %s230_s23, %s230_s23, %s231_s24 }
  0x49   : > { %223 = dma.done.wait (%p115_p6), [#allocation2 + $0x3], 64 }
  0x4a   : > { %225 = vsyncadd (%p115_p6), [#allocation2 + $0x3], 4294967232  ;;  %s11_s6 = sadd.s32 1, %s228_s6  }
  0x4b   : > { %p8_p0 = scmp.ge.s32.totalorder %s11_s6, 2  }
  0x4d   :  { %10 = sbr.rel (!%p8_p0) target bundleno = 1 (0x1), region = 38 }
  0x54   :  { %52 = vsyncmov [#allocation2] }
  0x57   :  { %s53_s12 = vpop.sfrf %52 }
  0x58   :  { %p100_p9 = scmp.ne.s32.totalorder %s53_s12, 0 }
  0x5a   :  { %57 = shalt.err (%p100_p9)  }
  0x5b   :  { %59 = vsyncmov [#allocation2 + $0x1] }
  0x5e   :  { %s60_s22 = vpop.sfrf %59 }
  0x5f   :  { %p101_p10 = scmp.ne.s32.totalorder %s60_s22, 0 }
  0x61   :  { %64 = shalt.err (%p101_p10)  }
  0x62   :  { %66 = vsyncmov [#allocation2 + $0x2] }
  0x65   :  { %s67_s23 = vpop.sfrf %66 }
  0x66   :  { %p102_p11 = scmp.ne.s32.totalorder %s67_s23, 0 }
  0x68   :  { %71 = shalt.err (%p102_p11)  }
  0x69   :  { %73 = vsyncmov [#allocation2 + $0x3] }
  0x6c   :  { %s74_s24 = vpop.sfrf %73 }
  0x6d   :  { %p103_p6 = scmp.ne.s32.totalorder %s74_s24, 0 }
  0x6f   :  { %78 = shalt.err (%p103_p6)  }
  0x70   :  { %80 = vsyncmov [#allocation2 + $0x4] }
  0x73   :  { %s81_s28 = vpop.sfrf %80 }
  0x74   :  { %p104_p12 = scmp.ne.s32.totalorder %s81_s28, 0 }
  0x76   :  { %85 = shalt.err (%p104_p12)  }
  0x77   :  { %87 = vsyncmov [#allocation2 + $0x5] }
  0x7a   :  { %s88_s0 = vpop.sfrf %87 }
  0x7b   :  { %p105_p13 = scmp.ne.s32.totalorder %s88_s0, 0 }
  0x7d   :  { %92 = shalt.err (%p105_p13)  }

</bundles_post_ra>
